<compile_context>
chip_gen: v7x
topology: tpu7x:2x2x1
jax: 0.10.0
libtpu: 0.0.40
codegen_flags: <defaults>
</compile_context>

<pallas_src>
import functools

import jax
import jax.numpy as jnp
from jax.experimental import pallas as pl
from jax.experimental.pallas import tpu as pltpu


# ----------------------------------------------------------------------------
# Fused single-pass kernel: one batch element per grid step, whole (C, HW) slab
# resident in VMEM.  Read x once, write once; fc runs on a fused (C, 2) RHS.
# ----------------------------------------------------------------------------
def _ca_fused_kernel(x_ref, w1_ref, w2_ref, o_ref):
    # x_ref / o_ref: (C, HW)   w1_ref: (Cr, C)   w2_ref: (C, Cr)
    xb = x_ref[...]
    xf = xb.astype(jnp.float32)                              # f32 accumulation
    hw = xb.shape[1]

    # Adaptive avg/max pool over the full spatial extent, kept as (C, 1)
    # columns (channels on sublanes) so the final broadcast needs no transpose.
    s = jnp.sum(xf, axis=1, keepdims=True) * (1.0 / hw)      # (C, 1)
    mx = jnp.max(xf, axis=1, keepdims=True)                  # (C, 1)

    # Fuse the two fc() passes: single (C, 2) RHS -> 2 matmuls instead of 4.
    pooled = jnp.concatenate([s, mx], axis=1)                # (C, 2)
    h = jnp.maximum(
        jnp.dot(w1_ref[...].astype(jnp.float32), pooled,
                preferred_element_type=jnp.float32), 0.0)    # (Cr, 2)
    y = jnp.dot(w2_ref[...].astype(jnp.float32), h,
                preferred_element_type=jnp.float32)          # (C, 2)
    att = jax.nn.sigmoid(y[:, 0:1] + y[:, 1:2])              # (C, 1)

    o_ref[...] = (xf * att).astype(o_ref.dtype)


# ----------------------------------------------------------------------------
# Tiled two-pass path (large H*W): pass 1 pools over HW tiles, pass 2 scales.
# ----------------------------------------------------------------------------
def _ca_pool_kernel(x_ref, w1_ref, w2_ref, att_ref, sum_acc, max_acc, *, hw, tile):
    # x_ref: (C, tile)  att_ref: (C, 1)  sum_acc/max_acc: (C, 1) f32 scratch
    t = pl.program_id(1)
    nt = pl.num_programs(1)

    @pl.when(t == 0)
    def _():
        sum_acc[...] = jnp.zeros_like(sum_acc)
        max_acc[...] = jnp.full_like(max_acc, -jnp.inf)

    xf = x_ref[...].astype(jnp.float32)                      # (C, tile)
    is_last = t == nt - 1

    def _accum(x_sum, x_max):
        sum_acc[...] += jnp.sum(x_sum, axis=1, keepdims=True)
        max_acc[...] = jnp.maximum(max_acc[...],
                                   jnp.max(x_max, axis=1, keepdims=True))

    if hw % tile != 0:
        # Only the boundary tile pays the lane-mask cost; interior tiles keep
        # the unmasked fast path (stays at the HBM roofline, esp. bf16/v7x).
        @pl.when(jnp.logical_not(is_last))
        def _():
            _accum(xf, xf)

        @pl.when(is_last)
        def _():
            lane = jax.lax.broadcasted_iota(jnp.int32, xf.shape, 1)
            valid = (t * tile + lane) < hw
            _accum(jnp.where(valid, xf, 0.0), jnp.where(valid, xf, -jnp.inf))
    else:
        _accum(xf, xf)

    @pl.when(is_last)
    def _():
        pooled = jnp.concatenate(
            [sum_acc[...] * (1.0 / hw), max_acc[...]], axis=1)          # (C, 2)
        h = jnp.maximum(
            jnp.dot(w1_ref[...].astype(jnp.float32), pooled,
                    preferred_element_type=jnp.float32), 0.0)           # (Cr, 2)
        y = jnp.dot(w2_ref[...].astype(jnp.float32), h,
                    preferred_element_type=jnp.float32)                 # (C, 2)
        att_ref[...] = jax.nn.sigmoid(y[:, 0:1] + y[:, 1:2]).astype(att_ref.dtype)


def _ca_scale_kernel(x_ref, att_ref, o_ref):
    # x_ref / o_ref: (C, tile)  att_ref: (C, 1) f32
    o_ref[...] = (x_ref[...].astype(jnp.float32) * att_ref[...]).astype(o_ref.dtype)


# ----------------------------------------------------------------------------
# Wrapper
# ----------------------------------------------------------------------------
def _round_down_128(n):
    return max(128, (int(n) // 128) * 128)


def _vmem_capacity_bytes():
    """Physical VMEM per TensorCore; conservative fallback = v7x's 64 MiB."""
    try:
        info = pltpu.get_tpu_info()
        for name in ("vmem_capacity_bytes", "vmem_size_bytes", "vmem_bytes"):
            v = getattr(info, name, None)
            if v:
                return int(v)
    except Exception:
        pass
    return 64 * 1024 * 1024


def channel_attention(x, w1, w2, *, force_tiled=False, tile_hw=None):
    """x: (B, C, H, W) NCHW; w1: (C//r, C); w2: (C, C//r) (1x1 conv weights squeezed)."""
    B, C, H, W = x.shape
    Cr = w1.shape[0]
    HW = H * W
    itemsize = jnp.dtype(x.dtype).itemsize
    w_itemsize = jnp.dtype(w1.dtype).itemsize

    xf = x.reshape(B, C, HW)          # metadata-only reshape (contiguous)

    # Generation-aware VMEM budget (~96 MiB on v5e/v6e, ~48 MiB on v7x) and an
    # explicit vmem_limit_bytes (v5e's 16 MiB default scope is too small).
    vmem_limit = int(_vmem_capacity_bytes() * 0.75)
    reserve = 2 * 1024 * 1024         # weights, scratch, compiler-internal
    budget = max(vmem_limit - reserve, 4 * 1024 * 1024)

    # Per-grid-step VMEM for the fused path: double-buffered in + out slabs,
    # the in-kernel f32 temporary (only materialized for non-f32 inputs), and
    # the double-buffered weights.
    f32_temp_bytes = C * HW * 4 if x.dtype != jnp.float32 else 0
    fused_block_bytes = (4 * C * HW * itemsize + f32_temp_bytes
                         + 4 * C * Cr * w_itemsize)
    use_fused = (not force_tiled) and (fused_block_bytes <= budget)

    fc_flops = 8 * C * Cr             # 2 matmuls x 2 columns x 2 flops/MAC

    if use_fused:
        # NOTE: grid=(B,) parallel -> on v7x with B==1 one TC idles; the tiled
        # path (parallel spatial axis) is preferable there for tiny batches.
        cost = pl.CostEstimate(
            flops=int(B * (2 * C * HW + fc_flops)),
            transcendentals=int(B * C),
            bytes_accessed=int(2 * B * C * HW * itemsize + 2 * C * Cr * w_itemsize),
        )
        out = pl.pallas_call(
            _ca_fused_kernel,
            out_shape=jax.ShapeDtypeStruct((B, C, HW), x.dtype),
            grid_spec=pltpu.PrefetchScalarGridSpec(
                num_scalar_prefetch=0,
                grid=(B,),
                in_specs=[
                    pl.BlockSpec((pl.Squeezed(), C, HW), lambda b: (b, 0, 0)),
                    pl.BlockSpec((Cr, C), lambda b: (0, 0)),
                    pl.BlockSpec((C, Cr), lambda b: (0, 0)),
                ],
                out_specs=pl.BlockSpec((pl.Squeezed(), C, HW), lambda b: (b, 0, 0)),
            ),
            compiler_params=pltpu.CompilerParams(
                dimension_semantics=("parallel",),
                vmem_limit_bytes=vmem_limit),
            cost_estimate=cost,
        )(xf, w1, w2)
        return out.reshape(B, C, H, W)

    # ---------------- spatially tiled two-pass path ----------------
    # Decoupled tile sizes: the pool pass only double-buffers its input (plus
    # an f32 temp), so it can take a ~2x larger tile than the scale pass
    # (double-buffered in + out + f32 temp).
    max_tile_pool = _round_down_128(budget // (C * (2 * itemsize + 4)))
    max_tile_scale = _round_down_128(budget // (C * (4 * itemsize + 4)))

    if tile_hw is not None:
        req = int(tile_hw)
        tile_pool = min(req, max_tile_pool)     # clamp: never trust user tile
        tile_scale = min(req, max_tile_scale)
    else:
        tile_pool = max_tile_pool
        tile_scale = max_tile_scale

    def _finalize(t):
        # Full-extent block is always legal; otherwise keep lanes 128-aligned.
        return HW if t >= HW else _round_down_128(t)

    tile_pool = _finalize(tile_pool)
    tile_scale = _finalize(tile_scale)
    nt_pool = pl.cdiv(HW, tile_pool)
    nt_scale = pl.cdiv(HW, tile_scale)

    # Pass 1: pooled stats + fc -> per-batch attention (B, C, 1) in f32.
    pool_cost = pl.CostEstimate(
        flops=int(B * (2 * C * HW + fc_flops)),
        transcendentals=int(B * C),
        bytes_accessed=int(B * C * HW * itemsize + B * C * 4 + 2 * C * Cr * w_itemsize),
    )
    att = pl.pallas_call(
        functools.partial(_ca_pool_kernel, hw=HW, tile=tile_pool),
        out_shape=jax.ShapeDtypeStruct((B, C, 1), jnp.float32),
        grid_spec=pltpu.PrefetchScalarGridSpec(
            num_scalar_prefetch=0,
            grid=(B, nt_pool),
            in_specs=[
                pl.BlockSpec((pl.Squeezed(), C, tile_pool), lambda b, t: (b, 0, t)),
                pl.BlockSpec((Cr, C), lambda b, t: (0, 0)),
                pl.BlockSpec((C, Cr), lambda b, t: (0, 0)),
            ],
            out_specs=pl.BlockSpec((pl.Squeezed(), C, 1), lambda b, t: (b, 0, 0)),
            scratch_shapes=[
                pltpu.VMEM((C, 1), jnp.float32),
                pltpu.VMEM((C, 1), jnp.float32),
            ],
        ),
        compiler_params=pltpu.CompilerParams(
            dimension_semantics=("parallel", "arbitrary"),
            vmem_limit_bytes=vmem_limit),
        cost_estimate=pool_cost,
    )(xf, w1, w2)

    # Pass 2: re-read x tiles and scale by the per-channel attention.
    scale_cost = pl.CostEstimate(
        flops=int(B * C * HW),
        transcendentals=0,
        bytes_accessed=int(2 * B * C * HW * itemsize + B * C * 4),
    )
    out = pl.pallas_call(
        _ca_scale_kernel,
        out_shape=jax.ShapeDtypeStruct((B, C, HW), x.dtype),
        grid_spec=pltpu.PrefetchScalarGridSpec(
            num_scalar_prefetch=0,
            grid=(B, nt_scale),
            in_specs=[
                pl.BlockSpec((pl.Squeezed(), C, tile_scale), lambda b, t: (b, 0, t)),
                pl.BlockSpec((pl.Squeezed(), C, 1), lambda b, t: (b, 0, 0)),
            ],
            out_specs=pl.BlockSpec((pl.Squeezed(), C, tile_scale), lambda b, t: (b, 0, t)),
        ),
        compiler_params=pltpu.CompilerParams(
            dimension_semantics=("parallel", "parallel"),
            vmem_limit_bytes=vmem_limit),
        cost_estimate=scale_cost,
    )(xf, att)
    return out.reshape(B, C, H, W)


# ----------------------------------------------------------------------------
# Pure-JAX reference mirroring the PyTorch forward.
# ----------------------------------------------------------------------------
def channel_attention_ref(x, w1, w2):
    avg = jnp.mean(x, axis=(2, 3))                  # (B, C)
    mx = jnp.max(x, axis=(2, 3))                    # (B, C)

    def fc(p):                                      # (B, C)
        h = jnp.maximum(p @ w1.T, 0.0)              # (B, C//r)
        return h @ w2.T                             # (B, C)

    att = jax.nn.sigmoid(fc(avg) + fc(mx))          # (B, C)
    return att[:, :, None, None] * x


if __name__ == "__main__":
    B, C, H, W = 2, 8, 16, 16
    ratio = 4
    Cr = C // ratio

    key = jax.random.PRNGKey(0)
    kx, k1, k2 = jax.random.split(key, 3)
    x = jax.random.normal(kx, (B, C, H, W), dtype=jnp.float32)
    # Conv2d(in, out, 1, bias=False) weights are (out, in, 1, 1); squeeze the 1x1.
    w1 = jax.random.normal(k1, (Cr, C), dtype=jnp.float32) * 0.1
    w2 = jax.random.normal(k2, (C, Cr), dtype=jnp.float32) * 0.1

    ref = channel_attention_ref(x, w1, w2)

    # Fused single-pass path (small slab fits the VMEM budget).
    out = jax.block_until_ready(channel_attention(x, w1, w2))
    assert out.shape == (B, C, H, W)
    assert jnp.allclose(out, ref, atol=1e-5, rtol=1e-5), "fused path mismatch"

    # Spatially tiled two-pass path (exercise multi-tile reduction).
    out_t = jax.block_until_ready(
        channel_attention(x, w1, w2, force_tiled=True, tile_hw=128))
    assert jnp.allclose(out_t, ref, atol=1e-5, rtol=1e-5), "tiled path mismatch"

    # Tiled path with a partial boundary tile (HW = 144, tile = 128 -> masking
    # only on the last tile).
    x2 = jax.random.normal(kx, (1, C, 12, 12), dtype=jnp.float32)
    ref2 = channel_attention_ref(x2, w1, w2)
    out2 = jax.block_until_ready(
        channel_attention(x2, w1, w2, force_tiled=True, tile_hw=128))
    assert jnp.allclose(out2, ref2, atol=1e-5, rtol=1e-5), "masked tile mismatch"

    # bf16 input through the fused path (f32-temp accounting + f32 pooling).
    xb = x.astype(jnp.bfloat16)
    refb = channel_attention_ref(xb.astype(jnp.float32), w1, w2)
    outb = jax.block_until_ready(channel_attention(xb, w1, w2))
    assert jnp.allclose(outb.astype(jnp.float32), refb, atol=2e-2, rtol=2e-2), \
        "bf16 fused path mismatch"

    print("KERNEL_OK")
</pallas_src>

<mosaic_0001>
module attributes {stable_mosaic.version = 11 : i64} {
  func.func @_ca_fused_kernel(%arg0: i32, %arg1: memref<1x8x256xf32, #tpu.memory_space<vmem>>, %arg2: memref<2x8xf32, #tpu.memory_space<vmem>>, %arg3: memref<8x2xf32, #tpu.memory_space<vmem>>, %arg4: memref<1x8x256xf32, #tpu.memory_space<vmem>>) attributes {dimension_semantics = [#tpu.dimension_semantics<parallel>], iteration_bounds = array<i64: 2>, scalar_prefetch = 0 : i64, scratch_operands = 0 : i64, tpu.core_type = #tpu.core_type<tc>, window_params = [{transform_indices = @transform_0, window_bounds = array<i64: 1, 8, 256>}, {pipeline_mode = #tpu.pipeline_mode<synchronous>, transform_indices = @transform_1, window_bounds = array<i64: 2, 8>}, {pipeline_mode = #tpu.pipeline_mode<synchronous>, transform_indices = @transform_2, window_bounds = array<i64: 8, 2>}, {transform_indices = @transform_3, window_bounds = array<i64: 1, 8, 256>}]} {
    %c0 = arith.constant 0 : index
    %c0_0 = arith.constant 0 : index
    %c0_1 = arith.constant 0 : index
    %0 = vector.load %arg1[%c0, %c0_0, %c0_1] : memref<1x8x256xf32, #tpu.memory_space<vmem>>, vector<1x8x256xf32>
    %1 = vector.shape_cast %0 : vector<1x8x256xf32> to vector<8x256xf32>
    %cst = arith.constant dense<0.000000e+00> : vector<8xf32>
    %2 = vector.multi_reduction <add>, %1, %cst [1] : vector<8x256xf32> to vector<8xf32>
    %3 = vector.shape_cast %2 : vector<8xf32> to vector<8x1xf32>
    %cst_2 = arith.constant 3.906250e-03 : f32
    %4 = vector.broadcast %cst_2 : f32 to vector<8x1xf32>
    %5 = arith.mulf %3, %4 : vector<8x1xf32>
    %cst_3 = arith.constant dense<0xFF800000> : vector<8xf32>
    %6 = vector.multi_reduction <maximumf>, %1, %cst_3 [1] : vector<8x256xf32> to vector<8xf32>
    %7 = vector.shape_cast %6 : vector<8xf32> to vector<8x1xf32>
    %8 = tpu.concatenate %5, %7 in 1 : vector<8x1xf32>, vector<8x1xf32> -> vector<8x2xf32>
    %c0_4 = arith.constant 0 : index
    %c0_5 = arith.constant 0 : index
    %9 = vector.load %arg2[%c0_4, %c0_5] : memref<2x8xf32, #tpu.memory_space<vmem>>, vector<2x8xf32>
    %cst_6 = arith.constant dense<0.000000e+00> : vector<2x2xf32>
    %10 = tpu.matmul %9, %8, %cst_6 {dimension_numbers = #tpu.dot_dimension_numbers<[1], [0], [0], [1], [0, 0, 1, 1], [], []>} : vector<2x8xf32>, vector<8x2xf32>, vector<2x2xf32> -> vector<2x2xf32>
    %cst_7 = arith.constant 0.000000e+00 : f32
    %11 = vector.broadcast %cst_7 : f32 to vector<2x2xf32>
    %12 = arith.maximumf %10, %11 : vector<2x2xf32>
    %c0_8 = arith.constant 0 : index
    %c0_9 = arith.constant 0 : index
    %13 = vector.load %arg3[%c0_8, %c0_9] : memref<8x2xf32, #tpu.memory_space<vmem>>, vector<8x2xf32>
    %cst_10 = arith.constant dense<0.000000e+00> : vector<8x2xf32>
    %14 = tpu.matmul %13, %12, %cst_10 {dimension_numbers = #tpu.dot_dimension_numbers<[1], [0], [0], [1], [0, 0, 1, 1], [], []>} : vector<8x2xf32>, vector<2x2xf32>, vector<8x2xf32> -> vector<8x2xf32>
    %15 = vector.extract_strided_slice %14 {offsets = [0, 0], sizes = [8, 1], strides = [1, 1]} : vector<8x2xf32> to vector<8x1xf32>
    %16 = vector.extract_strided_slice %14 {offsets = [0, 1], sizes = [8, 1], strides = [1, 1]} : vector<8x2xf32> to vector<8x1xf32>
    %17 = arith.addf %15, %16 : vector<8x1xf32>
    %18 = arith.negf %17 : vector<8x1xf32>
    %19 = math.exp %18 : vector<8x1xf32>
    %cst_11 = arith.constant 1.000000e+00 : f32
    %20 = vector.broadcast %cst_11 : f32 to vector<8x1xf32>
    %21 = arith.addf %20, %19 : vector<8x1xf32>
    %22 = arith.divf %20, %21 : vector<8x1xf32>
    %23 = vector.broadcast %22 : vector<8x1xf32> to vector<8x256xf32>
    %24 = arith.mulf %1, %23 : vector<8x256xf32>
    %c0_12 = arith.constant 0 : index
    %c0_13 = arith.constant 0 : index
    %c0_14 = arith.constant 0 : index
    %25 = vector.load %arg4[%c0_12, %c0_13, %c0_14] : memref<1x8x256xf32, #tpu.memory_space<vmem>>, vector<1x8x256xf32>
    %26 = vector.shape_cast %25 : vector<1x8x256xf32> to vector<8x256xf32>
    %27 = vector.shape_cast %24 : vector<8x256xf32> to vector<1x8x256xf32>
    tpu.vector_store %arg4[%c0_12, %c0_13, %c0_14], %27 {strides = array<i32>} : memref<1x8x256xf32, #tpu.memory_space<vmem>>, vector<1x8x256xf32>,
    return
  }
  func.func @transform_0(%arg0: i32) -> (i32, i32, i32) {
    %c0_i32 = arith.constant 0 : i32
    %c0_i32_0 = arith.constant 0 : i32
    %c0_i32_1 = arith.constant 0 : i32
    return %arg0, %c0_i32, %c0_i32_0 : i32, i32, i32
  }
  func.func @transform_1(%arg0: i32) -> (i32, i32) {
    %c0_i32 = arith.constant 0 : i32
    %c0_i32_0 = arith.constant 0 : i32
    %c0_i32_1 = arith.constant 0 : i32
    return %c0_i32, %c0_i32_0 : i32, i32
  }
  func.func @transform_2(%arg0: i32) -> (i32, i32) {
    %c0_i32 = arith.constant 0 : i32
    %c0_i32_0 = arith.constant 0 : i32
    %c0_i32_1 = arith.constant 0 : i32
    return %c0_i32, %c0_i32_0 : i32, i32
  }
  func.func @transform_3(%arg0: i32) -> (i32, i32, i32) {
    %c0_i32 = arith.constant 0 : i32
    %c0_i32_0 = arith.constant 0 : i32
    %c0_i32_1 = arith.constant 0 : i32
    return %arg0, %c0_i32, %c0_i32_0 : i32, i32, i32
  }
}

</mosaic_0001>

<bundles_post_ra>
// kernel: tpu_custom_call.1
= control target key start
LH: loop header
LB: loop body
LE: loop exit
PB: predicated region body
PF: predicated region fallthrough
CT: control target
= control target key end

     0   :  { %8 = vsyncpa [#allocation3], 0  ;;  %s843_s0 = inlined_call_operand.hbm [shape: f32[2,8,256], index: 0, kind: input, shape index: {}]   ;;  %s844_s1 = inlined_call_operand.vmem [shape: f32[2,8], index: 1, kind: input, shape index: {}]   ;;  %s845_s2 = inlined_call_operand.vmem [shape: f32[8,2], index: 2, kind: input, shape index: {}]   ;;  %s846_s3 = inlined_call_operand.hbm [shape: f32[2,8,256], index: 3, kind: output, shape index: {}]  }
   0x1   :  { %10 = vsyncpa [#allocation3 + $0x1], 0 }
   0x2   :  { %11 = vsyncpa [#allocation4], 0 }
   0x3   :  { %13 = vsyncpa [#allocation4 + $0x1], 0  ;;  %s672_s12 = smov 0   ;;  %s674_s13 = smov 0  }
   0x4   :  { %s676_s14 = smov 0   ;;  %s678_s15 = smov 0  }
   0x5 LB: > { %s693_s16 = sadd.s32 4294967295, %s644_s15   ;;  %s458_s17 = sadd.s32 4294967294, %s644_s15   ;;  %s644_s15 = sphi %s678_s15, %s861_s15   ;;  %s640_s14 = sphi %s676_s14, %s860_s14   ;;  %s636_s13 = sphi %s674_s13, %s859_s13   ;;  %s632_s12 = sphi %s672_s12, %s858_s12  }
   0x6   : > { %s697_s18 = sadd.s32 1, %s644_s15   ;;  %s26_s19 = sadd.s32 1, %s640_s14 }
   0x7   : > { %s23_s20 = ssub.s32 %s644_s15, %s697_s18  ;;  %p33_p0 = scmp.ne.s32.totalorder %s640_s14, %s636_s13 }
   0x8   : > { %p24_p1 = scmp.eq.s32.totalorder %s23_s20, 0  ;;  %p34_p2 = scmp.eq.s32.totalorder %s644_s15, 0 }
   0x9   : > { %p39_p3 = scmp.ne.s32.totalorder %s636_s13, %s632_s12  ;;  %p40_p4 = scmp.eq.s32.totalorder %s693_s16, 0 }
   0xa   : > { %s709_s21 = scalar_select %p24_p1, %s640_s14, %s26_s19  }
   0xb   : > { %p711_p5 = por %p34_p2, %p33_p0  ;;  %p715_p6 = por %p40_p4, %p39_p3 }
   0xc   : > { %p105_p7 = scmp.eq.s32.totalorder %s693_s16, 1  ;;  %p111_p8 = scmp.eq.s32.totalorder %s458_s17, 1 }
   0xd   : > { %p504_p10 = scmp.lt.s32.totalorder %s644_s15, 2  ;;  %s137_s26 = sand.u32 1, %s640_s14  }
   0xe   : > { %p722_p11 = por %p105_p7, %p33_p0  ;;  %p726_p12 = por %p111_p8, %p39_p3 }
   0xf   : > { %s476_s27 = sshll.u32 %s644_s15, 8  ;;  %s461_s28 = sshll.u32 %s137_s26, 4 }
  0x10   : > { %s850_s24 = scalar_select %p722_p11, 1, 0 }
  0x11   : > { %s851_s25 = scalar_select %p726_p12, 1, 0 }
  0x12   : > { %s735_s4 = scalar_lea.hbm %s843_s0, %s476_s27  ;;  %s141_s5 = scalar_lea.vmem [#allocation2], %s461_s28 }
  0x13   : > { %s149_s6 = sshll.u32 %s141_s5, 4  ;;  %p739_p13 = pnand %p504_p10, %p711_p5  ;;  %s743_s6 = int_to_ptr.vmem [resolvable:$true] %s149_s6 }
  0x14   : > { %s138_s8 = scalar_lea.sflag [#allocation3], %s137_s26  ;;  %s548_s9 = scalar_lea.hbm %s735_s4, 256 }
  0x15   : > { %p549_p2 = scmp.ne.s32.totalorder %s735_s4, %s548_s9  ;;  %p550_p3 = pneg %p739_p13 }
  0x16   : > { %s553_s17 = scalar_lea.hbm %s843_s0, 512  ;;  %p554_p5 = scmp.lt.u32.totalorder %s735_s4, %s843_s0 }
  0x17   : > { %p551_p4 = pnand %p550_p3, %p549_p2  ;;  %p555_p8 = scmp.lt.u32.totalorder %s553_s17, %s548_s9 }
  0x18   : > { %p557_p9 = scmp.lt.u32.totalorder %s548_s9, %s735_s4 }
  0x19   : > { %p552_p7 = pneg %p551_p4  ;;  %p556_p10 = por %p555_p8, %p554_p5 }
  0x1b   : > { %p558_p0 = por %p557_p9, %p556_p10 }
  0x1d   : > { %p559_p1 = pnand %p558_p0, %p552_p7 }
  0x1f   : > { %562 = shalt.err (!%p559_p1)
}
  0x20   : > { %s563_s22 = scalar_lea.vmem %s743_s6, 256  ;;  %s646_s26 = smov [#allocation2]  }
  0x21   : > { %p564_p2 = scmp.ne.s32.totalorder %s743_s6, %s563_s22  ;;  %s568_s27 = sshll.u32 %s646_s26, 4  ;;  %s569_s27 = int_to_ptr.vmem [resolvable:$false] %s568_s27 }
  0x22   : > { %s570_s28 = scalar_lea.vmem %s569_s27, 512  ;;  %p571_p11 = scmp.lt.s32.totalorder %s743_s6, %s569_s27 }
  0x23   : > { %p566_p4 = pnand %p564_p2, %p550_p3  ;;  %p572_p5 = scmp.lt.s32.totalorder %s570_s28, %s563_s22 }
  0x25   : > { %p567_p12 = pneg %p566_p4  ;;  %p573_p8 = por %p572_p5, %p571_p11 }
  0x27   : > { %p574_p9 = pnand %p573_p8, %p567_p12 }
  0x29   : > { %577 = shalt.err (!%p574_p9)
}
  0x2a   : > { %499 = dma.hbm_to_vmem [thread:$0]  (!%p739_p13), %s735_s4, 256, %s743_s6, %s138_s8  }
  0x2b   : > { %p853_p0 = scmp.lt.s32.totalorder %s644_s15, 3  ;;  %p854_p1 = scmp.ge.s32.totalorder %s644_s15, 1 }
  0x2d   : > { %p155_p3 = pnand %p854_p1, %p853_p0 }
  0x2e   : > { %s777_s29 = sand.u32 (!%p155_p3), 1, %s636_s13  }
  0x2f   : > { %158 = sbr.rel (%p155_p3) target bundleno = 920 (0x398), region = 32  ;;  %s465_s30 = sshll.u32 (!%p155_p3), %s777_s29, 4 }
  0x30   : > { %s161_s5 = scalar_lea.sflag (!%p155_p3), [#allocation3], %s777_s29  ;;  %s164_s7 = scalar_lea.vmem (!%p155_p3), [#allocation2], %s465_s30 }
  0x36   : > { %623 = dma.done.wait (%p715_p6), %s161_s5, 256  }
  0x37   : > { %625 = vsyncadd (%p715_p6), %s161_s5, 4294967040  ;;  %v187_v0 = vld [vmem:[%s164_s7] sm:$0xff]  ;;  %v188_v1 = vld [vmem:[%s164_s7 + $0x8] sm:$0xff]  ;;  %v647_v4 = vmov 0.0   ;;  %vm648_vm0 = vmmov 0   ;;  %vm196_vm1 = vcmask 7168  }
  0x38   : > { %v189_v2 = vadd.f32 %v188_v1, %v187_v0  ;;  %v193_v3 = vmax.f32 %v187_v0, %v188_v1  ;;  %482 = vmatprep.subr.mxu0 %v647_v4  ;;  %487 = vmatprep.subr.mxu1 %v647_v4  ;;  %v198_v8 = vld [vmem:[%s844_s1] sm:$0x3]  ;;  %vm199_vm2 = vcmask 64512   ;;  %vm279_vm3 = vcmask 1041408   ;;  %s649_s9 = smov 127   ;;  %s477_s10 = sshll.u32 %s693_s16, 8 }
  0x39   : > { %484 = vmatprep.mubr.msk.f32.mxu0 %vm648_vm0, %v647_v4  ;;  %489 = vmatprep.mubr.msk.f32.mxu1 %vm648_vm0, %v647_v4  ;;  %v274_v13 = vld [vmem:[%s845_s2] sm:$0xff]  ;;  %vm275_vm4 = vcmask 15360   ;;  %v650_v16 = vmov 0   ;;  %s186_s11 = scalar_lea.vmem [#allocation5], %s465_s30  ;;  %s799_s22 = scalar_lea.hbm %s846_s3, %s477_s10 }
  0x3a   : > { %190 = vadd.xlane.f32.xlu0 %v189_v2  ;;  %542 = vset.pattern.permute.xlu1 %v650_v16  ;;  %s388_s17 = sshll.u32 %s186_s11, 4  ;;  %s374_s26 = scalar_lea.sflag [#allocation4], %s777_s29  ;;  %s801_s17 = int_to_ptr.vmem [resolvable:$true] %s388_s17 }
  0x3b   : > { %543 = vset.pattern.permute.xlu0 %v650_v16  ;;  %s578_s16 = scalar_lea.vmem %s801_s17, 256  ;;  %p855_p11 = scmp.ne.s32.totalorder %s850_s24, 0 }
  0x3c   : > { %p579_p6 = scmp.ne.s32.totalorder %s801_s17, %s578_s16  ;;  %s651_s27 = smov [#allocation5]  }
  0x3d   : > { %s582_s28 = sshll.u32 %s651_s27, 4  ;;  %s583_s28 = int_to_ptr.vmem [resolvable:$false] %s582_s28 }
  0x3e   : > { %194 = vmax.xlane.f32.xlu0 %v193_v3  ;;  %p580_p12 = pnand %p579_p6, %p855_p11  ;;  %s584_s30 = scalar_lea.vmem %s583_s28, 512 }
  0x3f   : > { %p585_p7 = scmp.lt.s32.totalorder %s801_s17, %s583_s28  ;;  %p586_p10 = scmp.lt.s32.totalorder %s584_s30, %s578_s16 }
  0x40   : > { %p581_p13 = pneg %p580_p12 }
  0x41   : > { %p587_p2 = por %p586_p10, %p585_p7 }
  0x43   : > { %p588_p4 = pnand %p587_p2, %p581_p13 }
  0xc7   : > { %v191_v5 = vpop.xlane.xlu0 %190 }
  0xc8   : > { %v192_v6 = vmul.f32 0.00390625, %v191_v5 }
  0xcb   : > { %v195_v7 = vpop.xlane.xlu0 %194 }
  0xcc   : > { %v197_v9 = vsel %vm196_vm1, %v192_v6, %v195_v7 }
  0xcd   : > { %483 = vmatpush3.msra.mxu0 %v197_v9 }
  0xce   : > { %485 = vmatmul.mubr.msk.f32.vlgmr.msra.gmra.mrb[0].mxu0 %vm199_vm2, %v198_v8 }
 0x1a1   : > { %v269_v10 = vpop.f32.mrb[0].mxu0 }
 0x1a2   : > { %v273_v11 = vmax.f32 %v269_v10, 0.0  ;;  %v486_v12 = vpop.f32.mrb[1].mxu0 }
 0x1a4   : > { %488 = vmatpush3.msk.msra.mxu1 %vm279_vm3, %v273_v11 }
 0x1a5   : > { %490 = vmatmul.mubr.msk.f32.vlgmr.msra.gmra.mrb[0].mxu1 %vm275_vm4, %v274_v13 }
 0x278   : > { %v349_v14 = vpop.f32.mrb[0].mxu1 }
 0x279   : > { %354 = vrot.lane.b32.xlu1 %v349_v14, %s649_s9  ;;  %v491_v15 = vpop.f32.mrb[1].mxu1 }
 0x2eb   : > { %v355_v17 = vpop.permute.xlu1 %354 }
 0x2ec   : > { %v357_v18 = vadd.f32 %v355_v17, %v349_v14 }
 0x2ee   : > { %v470_v19 = vmul.f32 -1.442695, %v357_v18 }
 0x2f0   : > { %544 = vpow2.f32 %v470_v19 }
 0x2fa   : > { %v545_v20 = vpop.eup %544 }
 0x2fb   : > { %v361_v21 = vadd.f32 1.0, %v545_v20 }
 0x2fd   : > { %546 = vrcp.f32 %v361_v21 }
 0x307   : > { %v547_v22 = vpop.eup %546 }
 0x308   : > { %366 = vperm.xlu1 %542, %v547_v22  }
 0x387   : > { %v367_v23 = vpop.permute.xlu1 %366 }
 0x388   : > { %v369_v24 = vmul.f32 %v367_v23, %v187_v0  ;;  %v370_v25 = vmul.f32 %v367_v23, %v188_v1 }
 0x38a   : > { %371 = vst [vmem:[%s186_s11] sm:$0xff] %v369_v24  ;;  %372 = vst [vmem:[%s186_s11 + $0x8] sm:$0xff] %v370_v25 }
 0x38b   : > { %591 = shalt.err (!%p588_p4)
}
 0x38c   : > { %s592_s29 = scalar_lea.hbm %s799_s22, 256  ;;  %s596_s4 = scalar_lea.hbm %s846_s3, 512 }
 0x38d   : > { %p593_p5 = scmp.ne.s32.totalorder %s799_s22, %s592_s29  ;;  %p597_p0 = scmp.lt.u32.totalorder %s799_s22, %s846_s3 }
 0x38e   : > { %p598_p1 = scmp.lt.u32.totalorder %s596_s4, %s592_s29  ;;  %p600_p6 = scmp.lt.u32.totalorder %s592_s29, %s799_s22 }
 0x38f   : > { %p594_p8 = pnand %p593_p5, %p855_p11 }
 0x390   : > { %p599_p3 = por %p598_p1, %p597_p0 }
 0x391   : > { %p595_p9 = pneg %p594_p8 }
 0x392   : > { %p601_p12 = por %p600_p6, %p599_p3 }
 0x394   : > { %p602_p13 = pnand %p601_p12, %p595_p9 }
 0x396   : > { %605 = shalt.err (!%p602_p13)
}
 0x397   : > { %494 = dma.vmem_to_hbm [thread:$0]  (%p855_p11), %s801_s17, 256, %s799_s22, %s374_s26  }
 0x398 PF: > { %s400_s8 = sand.u32 1, %s632_s12   ;;  %p856_p7 = scmp.ne.s32.totalorder %s851_s25, 0 }
 0x399   : > { %p857_p10 = scmp.ge.s32.totalorder %s644_s15, 2  ;;  %s401_s9 = scalar_lea.sflag [#allocation4], %s400_s8 }
 0x39b   : > { %p501_p2 = pnand %p857_p10, %p856_p7 }
 0x39d   : > { %627 = dma.done.wait (!%p501_p2), %s401_s9, 256  }
 0x39e   : > { %629 = vsyncadd (!%p501_p2), %s401_s9, 4294967040  ;;  %p16_p4 = scmp.ge.s32.totalorder %s697_s18, 4   ;;  %s858_s12 = smov %s636_s13 }
 0x39f   : > { %s859_s13 = smov %s640_s14  ;;  %s860_s14 = smov %s709_s21 }
 0x3a0   : > { %s861_s15 = smov %s697_s18  ;;  %18 = sbr.rel (!%p16_p4) target bundleno = 5 (0x5), region = 77 }
 0x3a7   :  { %406 = vsyncpa [#allocation3], 1 }
 0x3a8   :  { %408 = vsyncpa [#allocation3 + $0x1], 1 }
 0x3a9   :  { %409 = vsyncpa [#allocation4], 1 }
 0x3aa   :  { %411 = vsyncpa [#allocation4 + $0x1], 1 }

</bundles_post_ra>
